<compile_context>
chip_gen: v5e
topology: v5e:2x2
jax: 0.10.0
libtpu: 0.0.40
codegen_flags: <defaults>
</compile_context>

<pallas_src>
import functools
import math

import jax
import jax.numpy as jnp
from jax.experimental import pallas as pl
from jax.experimental.pallas import tpu as pltpu


_VMEM_LIMIT = 48 << 20     # explicit scoped-VMEM limit: < v7x 64 MiB physical, fine on v5e/v6e
_LIVE_BUDGET = 32 << 20    # target total live bytes (double-buffered x + out + pe tiles)
_SUBLANE = {4: 8, 2: 16, 1: 32}   # sublane multiple per dtype itemsize


def _round_up(n, m):
    return ((n + m - 1) // m) * m


@functools.lru_cache(maxsize=None)
def _pe_table(n_rows: int, d_model: int, dtype_name: str):
    """Sinusoidal table matching the PyTorch `pe` buffer rows [0, n_rows).

    Built once per (rows, d_model, dtype) and cached -- no per-forward rebuild.
    Uses stack+reshape (no zeros-init + strided scatters) and tolerates odd d_model.
    """
    half = (d_model + 1) // 2
    position = jnp.arange(n_rows, dtype=jnp.float32)[:, None]                    # (R, 1)
    div_term = jnp.exp(jnp.arange(half, dtype=jnp.float32)
                       * (-2.0 * math.log(10000.0) / d_model))                   # (half,)
    ang = position * div_term                                                     # (R, half)
    pe = jnp.stack([jnp.sin(ang), jnp.cos(ang)], axis=-1).reshape(n_rows, 2 * half)
    return pe[:, :d_model].astype(jnp.dtype(dtype_name))


@functools.lru_cache(maxsize=None)
def _pe_flat(seq: int, d_model: int, dtype_name: str):
    """pe[:seq] flattened to a lane-dense (1, seq*d_model) row (cached)."""
    return _pe_table(seq, d_model, dtype_name).reshape(1, seq * d_model)


def _add_pe_kernel(x_ref, pe_ref, o_ref):
    # Pure VPU elementwise add; pe broadcasts over the leading batch dim of x.
    o_ref[...] = x_ref[...] + pe_ref[...]


# ---------------------------------------------------------------------------
# Path A: d_model % 128 == 0, batch folded into the block, grid over seq tiles.
# ---------------------------------------------------------------------------
@functools.partial(jax.jit, static_argnames=("tile_s",))
def _add_pe_3d_fold(x, pe, *, tile_s):
    B, S, D = x.shape
    itemsize = jnp.dtype(x.dtype).itemsize
    n_s = pl.cdiv(S, tile_s)
    return pl.pallas_call(
        _add_pe_kernel,
        out_shape=jax.ShapeDtypeStruct((B, S, D), x.dtype),
        grid_spec=pltpu.PrefetchScalarGridSpec(
            num_scalar_prefetch=0,
            grid=(n_s,),
            in_specs=[
                pl.BlockSpec((B, tile_s, D), lambda s: (0, s, 0)),   # x tile (batch folded)
                pl.BlockSpec((tile_s, D), lambda s: (s, 0)),          # pe tile
            ],
            out_specs=pl.BlockSpec((B, tile_s, D), lambda s: (0, s, 0)),
        ),
        compiler_params=pltpu.CompilerParams(
            dimension_semantics=("parallel",),
            vmem_limit_bytes=_VMEM_LIMIT,
        ),
        cost_estimate=pl.CostEstimate(
            flops=B * S * D,
            transcendentals=0,
            bytes_accessed=(2 * B * S * D + S * D) * itemsize,
        ),
    )(x, pe)


# ---------------------------------------------------------------------------
# Path B: d_model % 128 == 0 but batch too large to fold -> grid over (seq, batch),
# batch innermost so the pe block index is constant across it (tile reused).
# ---------------------------------------------------------------------------
@functools.partial(jax.jit, static_argnames=("tile_s",))
def _add_pe_3d_grid(x, pe, *, tile_s):
    B, S, D = x.shape
    itemsize = jnp.dtype(x.dtype).itemsize
    n_s = pl.cdiv(S, tile_s)
    return pl.pallas_call(
        _add_pe_kernel,
        out_shape=jax.ShapeDtypeStruct((B, S, D), x.dtype),
        grid_spec=pltpu.PrefetchScalarGridSpec(
            num_scalar_prefetch=0,
            grid=(n_s, B),
            in_specs=[
                pl.BlockSpec((1, tile_s, D), lambda s, b: (b, s, 0)),
                pl.BlockSpec((tile_s, D), lambda s, b: (s, 0)),
            ],
            out_specs=pl.BlockSpec((1, tile_s, D), lambda s, b: (b, s, 0)),
        ),
        compiler_params=pltpu.CompilerParams(
            dimension_semantics=("parallel", "parallel"),
            vmem_limit_bytes=_VMEM_LIMIT,
        ),
        cost_estimate=pl.CostEstimate(
            flops=B * S * D,
            transcendentals=0,
            bytes_accessed=(2 * B * S * D + S * D) * itemsize,
        ),
    )(x, pe)


# ---------------------------------------------------------------------------
# Path C: d_model % 128 != 0 -> flatten to lane-dense (batch, seq*d_model).
# The (seq, d) -> (seq*d,) collapse is a free contiguous reshape; stores are
# unmasked along lanes instead of lane-masked partial vst at d_model < 128.
# ---------------------------------------------------------------------------
@functools.partial(jax.jit, static_argnames=("tile_f",))
def _add_pe_flat(x, pe_flat, *, tile_f):
    B, S, D = x.shape
    F = S * D
    itemsize = jnp.dtype(x.dtype).itemsize
    x2 = x.reshape(B, F)
    n_f = pl.cdiv(F, tile_f)
    out2 = pl.pallas_call(
        _add_pe_kernel,
        out_shape=jax.ShapeDtypeStruct((B, F), x.dtype),
        grid_spec=pltpu.PrefetchScalarGridSpec(
            num_scalar_prefetch=0,
            grid=(n_f,),
            in_specs=[
                pl.BlockSpec((B, tile_f), lambda f: (0, f)),   # x tile (batch folded)
                pl.BlockSpec((1, tile_f), lambda f: (0, f)),   # pe tile
            ],
            out_specs=pl.BlockSpec((B, tile_f), lambda f: (0, f)),
        ),
        compiler_params=pltpu.CompilerParams(
            dimension_semantics=("parallel",),
            vmem_limit_bytes=_VMEM_LIMIT,
        ),
        cost_estimate=pl.CostEstimate(
            flops=B * F,
            transcendentals=0,
            bytes_accessed=(2 * B * F + F) * itemsize,
        ),
    )(x2, pe_flat)
    return out2.reshape(B, S, D)


def positional_encoding(x):
    """x: (batch, seq, d_model) -> x + pe[:seq]   (dropout = identity, eval mode)."""
    B, S, D = x.shape
    dtype = jnp.dtype(x.dtype)
    itemsize = dtype.itemsize
    sub = _SUBLANE.get(itemsize, 8)

    if D % 128 == 0:
        # 3-D layout is already lane-dense. Try to fold batch into the block.
        # live bytes per seq row = double-buffered (x + out) * B  +  pe
        per_row_fold = 2 * (2 * B + 1) * D * itemsize
        tile_s_fold = (_LIVE_BUDGET // per_row_fold) // sub * sub
        if tile_s_fold >= sub:
            tile_s = min(tile_s_fold, _round_up(S, sub))
            rows = pl.cdiv(S, tile_s) * tile_s
            pe = _pe_table(rows, D, dtype.name)
            return _add_pe_3d_fold(x, pe, tile_s=tile_s)
        # batch too large to fold: grid over (seq, batch), batch innermost.
        per_row = 2 * 3 * D * itemsize
        tile_s = max(sub, min((_LIVE_BUDGET // per_row) // sub * sub, _round_up(S, sub)))
        rows = pl.cdiv(S, tile_s) * tile_s
        pe = _pe_table(rows, D, dtype.name)
        return _add_pe_3d_grid(x, pe, tile_s=tile_s)

    # d_model not a multiple of 128: lane-dense flat layout.
    F = S * D
    B_pad = _round_up(B, sub)     # sublane padding of the (B, F) / (1, F) tiles in VMEM
    per_lane = 2 * (2 * B_pad + sub) * itemsize
    tile_f = (_LIVE_BUDGET // per_lane) // 128 * 128
    tile_f = max(128, min(tile_f, _round_up(F, 128)))
    pe_flat = _pe_flat(S, D, dtype.name)
    return _add_pe_flat(x, pe_flat, tile_f=tile_f)


if __name__ == "__main__":
    key = jax.random.PRNGKey(0)
    batch, seq, d_model = 2, 8, 32

    # d_model = 32 exercises the lane-dense flat path.
    x = jax.random.normal(key, (batch, seq, d_model), jnp.float32)
    out = jax.block_until_ready(positional_encoding(x))
    ref = x + _pe_table(seq, d_model, "float32")[None]
    assert out.shape == (batch, seq, d_model)
    assert jnp.allclose(out, ref, atol=1e-6, rtol=1e-6)

    # seq*d_model not a multiple of 128 exercises the partial-last-block masking.
    seq2 = 13
    x2 = jax.random.normal(jax.random.PRNGKey(1), (batch, seq2, d_model), jnp.float32)
    out2 = jax.block_until_ready(positional_encoding(x2))
    ref2 = x2 + _pe_table(seq2, d_model, "float32")[None]
    assert out2.shape == (batch, seq2, d_model)
    assert jnp.allclose(out2, ref2, atol=1e-6, rtol=1e-6)

    # d_model multiple of 128 exercises the 3-D folded-batch path.
    seq3, d3 = 24, 128
    x3 = jax.random.normal(jax.random.PRNGKey(2), (batch, seq3, d3), jnp.float32)
    out3 = jax.block_until_ready(positional_encoding(x3))
    ref3 = x3 + _pe_table(seq3, d3, "float32")[None]
    assert out3.shape == (batch, seq3, d3)
    assert jnp.allclose(out3, ref3, atol=1e-6, rtol=1e-6)

    print("KERNEL_OK")
</pallas_src>

<mosaic_0001>
module attributes {stable_mosaic.version = 11 : i64} {
  func.func @_add_pe_kernel(%arg0: i32, %arg1: memref<2x256xf32, #tpu.memory_space<vmem>>, %arg2: memref<1x256xf32, #tpu.memory_space<vmem>>, %arg3: memref<2x256xf32, #tpu.memory_space<vmem>>) attributes {dimension_semantics = [#tpu.dimension_semantics<parallel>], iteration_bounds = array<i64: 1>, scalar_prefetch = 0 : i64, scratch_operands = 0 : i64, tpu.core_type = #tpu.core_type<tc>, window_params = [{transform_indices = @transform_0, window_bounds = array<i64: 2, 256>}, {transform_indices = @transform_1, window_bounds = array<i64: 1, 256>}, {transform_indices = @transform_2, window_bounds = array<i64: 2, 256>}]} {
    %c0 = arith.constant 0 : index
    %c0_0 = arith.constant 0 : index
    %0 = vector.load %arg1[%c0, %c0_0] : memref<2x256xf32, #tpu.memory_space<vmem>>, vector<2x256xf32>
    %c0_1 = arith.constant 0 : index
    %c0_2 = arith.constant 0 : index
    %1 = vector.load %arg2[%c0_1, %c0_2] : memref<1x256xf32, #tpu.memory_space<vmem>>, vector<1x256xf32>
    %2 = vector.broadcast %1 : vector<1x256xf32> to vector<2x256xf32>
    %3 = arith.addf %0, %2 : vector<2x256xf32>
    %c0_3 = arith.constant 0 : index
    %c0_4 = arith.constant 0 : index
    %4 = vector.load %arg3[%c0_3, %c0_4] : memref<2x256xf32, #tpu.memory_space<vmem>>, vector<2x256xf32>
    tpu.vector_store %arg3[%c0_3, %c0_4], %3 {strides = array<i32>} : memref<2x256xf32, #tpu.memory_space<vmem>>, vector<2x256xf32>,
    return
  }
  func.func @transform_0(%arg0: i32) -> (i32, i32) {
    %c0_i32 = arith.constant 0 : i32
    %c0_i32_0 = arith.constant 0 : i32
    return %c0_i32, %arg0 : i32, i32
  }
  func.func @transform_1(%arg0: i32) -> (i32, i32) {
    %c0_i32 = arith.constant 0 : i32
    %c0_i32_0 = arith.constant 0 : i32
    return %c0_i32, %arg0 : i32, i32
  }
  func.func @transform_2(%arg0: i32) -> (i32, i32) {
    %c0_i32 = arith.constant 0 : i32
    %c0_i32_0 = arith.constant 0 : i32
    return %c0_i32, %arg0 : i32, i32
  }
}

</mosaic_0001>

<bundles_post_ra>
// kernel: _add_pe_flat.1
= control target key start
LH: loop header
LB: loop body
LE: loop exit
PB: predicated region body
PF: predicated region fallthrough
CT: control target
= control target key end

     0   :  { %vm17_vm0 = vcmask 1041408   ;;  %s50_s1 = inlined_call_operand.vmem [shape: f32[1,256], index: 1, kind: input, shape index: {}]   ;;  %s51_s0 = inlined_call_operand.vmem [shape: f32[2,256], index: 0, kind: input, shape index: {}]   ;;  %s52_s2 = inlined_call_operand.vmem [shape: f32[2,256], index: 2, kind: output, shape index: {}]  }
   0x1   :  { %v12_v0 = vld [vmem:[%s50_s1] sm:$0x3] }
   0x2   :  { %v14_v1 = vperm.slane %v12_v0, 0  ;;  %v15_v2 = vperm.slane %v12_v0, 1  ;;  %v11_v3 = vld [vmem:[%s51_s0] sm:$0xf] }
   0x4   :  { %v16_v4 = vrot.slane %v15_v2, 6 }
   0x6   :  { %v18_v5 = vsel %vm17_vm0, %v14_v1, %v16_v4 }
   0x7   :  { %v20_v6 = vadd.f32 %v18_v5, %v11_v3 }
   0x9   :  { %21 = vst [vmem:[%s52_s2] sm:$0xf] %v20_v6 }

</bundles_post_ra>
